<compile_context>
chip_gen: v6e
topology: v6e:2x2x1
jax: 0.10.0
libtpu: 0.0.40
codegen_flags: <defaults>
</compile_context>

<pallas_src>
import functools
import math

import numpy as np
import jax
import jax.numpy as jnp
from jax.experimental import pallas as pl
from jax.experimental.pallas import tpu as pltpu

INTERMEDIATE_IDX = {"vits": [2, 5, 8, 11], "vitb": [2, 5, 8, 11],
                    "vitl": [4, 11, 17, 23], "vitg": [9, 19, 29, 39]}

# Conservative scoped-VMEM budget that is valid on v5e / v6e / v7x.
VMEM_LIMIT = 32 * 1024 * 1024


def _round_up(v, m):
    return (v + m - 1) // m * m


def _apply_act(x, act):
    if act == "relu":
        return jnp.maximum(x, 0.0)
    if act == "gelu":
        # TODO(synk): PyTorch nn.GELU defaults to erf; tanh approximation used.
        c = math.sqrt(2.0 / math.pi)
        return 0.5 * x * (1.0 + jnp.tanh(c * (x + 0.044715 * x * x * x)))
    return x


# ----------------------------------------------------------------------------
# Generic tiled matmul (bf16 operands, f32 accumulation, bias + act epilogue)
# ----------------------------------------------------------------------------

def _mm_kernel(a_ref, b_ref, bias_ref, o_ref, acc_ref, *, act):
    @pl.when(pl.program_id(2) == 0)
    def _():
        acc_ref[...] = jnp.zeros_like(acc_ref)

    acc_ref[...] += jnp.dot(a_ref[...], b_ref[...],
                            preferred_element_type=jnp.float32)

    @pl.when(pl.program_id(2) == pl.num_programs(2) - 1)
    def _():
        o_ref[...] = _apply_act(acc_ref[...] + bias_ref[...], act)


def pallas_matmul(a, w, bias=None, act="none", tm=256, tn=256, tk=1024):
    """act(a @ w + bias), a:(M,K) f32, w:(K,N) f32 -> (M,N) f32."""
    M, K = a.shape
    _, N = w.shape
    TM = min(tm, _round_up(M, 8))
    TN = min(tn, _round_up(N, 128))
    TK = min(tk, _round_up(K, 128))
    Mp, Np, Kp = _round_up(M, TM), _round_up(N, TN), _round_up(K, TK)
    a_p = jnp.pad(a.astype(jnp.bfloat16), ((0, Mp - M), (0, Kp - K)))
    w_p = jnp.pad(w.astype(jnp.bfloat16), ((0, Kp - K), (0, Np - N)))
    if bias is None:
        bias = jnp.zeros((N,), jnp.float32)
    b_p = jnp.pad(bias.astype(jnp.float32), (0, Np - N)).reshape(1, Np)
    grid = (Mp // TM, Np // TN, Kp // TK)
    out = pl.pallas_call(
        functools.partial(_mm_kernel, act=act),
        out_shape=jax.ShapeDtypeStruct((Mp, Np), jnp.float32),
        grid=grid,
        in_specs=[
            pl.BlockSpec((TM, TK), lambda i, j, k: (i, k)),
            pl.BlockSpec((TK, TN), lambda i, j, k: (k, j)),
            pl.BlockSpec((1, TN), lambda i, j, k: (0, j)),
        ],
        out_specs=pl.BlockSpec((TM, TN), lambda i, j, k: (i, j)),
        scratch_shapes=[pltpu.VMEM((TM, TN), jnp.float32)],
        compiler_params=pltpu.CompilerParams(
            dimension_semantics=("parallel", "parallel", "arbitrary"),
            vmem_limit_bytes=VMEM_LIMIT),
        cost_estimate=pl.CostEstimate(
            flops=2 * Mp * Np * Kp, transcendentals=0,
            bytes_accessed=2 * (Mp * Kp + Kp * Np) + 4 * Mp * Np),
    )(a_p, w_p, b_p)
    return out[:M, :N]


# ----------------------------------------------------------------------------
# Fused LayerNorm -> matmul (LN prologue on the input tile, K kept whole)
# ----------------------------------------------------------------------------

def _ln_mm_kernel(x_ref, g_ref, bt_ref, w_ref, bias_ref, o_ref, *, act, eps):
    x = x_ref[...]
    mu = jnp.mean(x, axis=-1, keepdims=True)
    xc = x - mu
    var = jnp.mean(xc * xc, axis=-1, keepdims=True)
    xn = xc * jax.lax.rsqrt(var + eps) * g_ref[...] + bt_ref[...]
    acc = jnp.dot(xn.astype(jnp.bfloat16), w_ref[...],
                  preferred_element_type=jnp.float32)
    o_ref[...] = _apply_act(acc + bias_ref[...], act)


def ln_matmul(x, gamma, beta, w, bias, act="none", eps=1e-6, tm=256, tn=256):
    M, K = x.shape
    _, N = w.shape
    TM = min(tm, _round_up(M, 8))
    TN = min(tn, _round_up(N, 128))
    Mp, Np = _round_up(M, TM), _round_up(N, TN)
    x_p = jnp.pad(x.astype(jnp.float32), ((0, Mp - M), (0, 0)))
    w_p = jnp.pad(w.astype(jnp.bfloat16), ((0, 0), (0, Np - N)))
    b_p = jnp.pad(bias.astype(jnp.float32), (0, Np - N)).reshape(1, Np)
    g2 = gamma.reshape(1, K).astype(jnp.float32)
    bt2 = beta.reshape(1, K).astype(jnp.float32)
    out = pl.pallas_call(
        functools.partial(_ln_mm_kernel, act=act, eps=eps),
        out_shape=jax.ShapeDtypeStruct((Mp, Np), jnp.float32),
        grid=(Mp // TM, Np // TN),
        in_specs=[
            pl.BlockSpec((TM, K), lambda i, j: (i, 0)),
            pl.BlockSpec((1, K), lambda i, j: (0, 0)),
            pl.BlockSpec((1, K), lambda i, j: (0, 0)),
            pl.BlockSpec((K, TN), lambda i, j: (0, j)),
            pl.BlockSpec((1, TN), lambda i, j: (0, j)),
        ],
        out_specs=pl.BlockSpec((TM, TN), lambda i, j: (i, j)),
        compiler_params=pltpu.CompilerParams(
            dimension_semantics=("parallel", "parallel"),
            vmem_limit_bytes=VMEM_LIMIT),
    )(x_p, g2, bt2, w_p, b_p)
    return out[:M, :N]


# ----------------------------------------------------------------------------
# Fused matmul -> layer-scale -> residual add (epilogue fusion)
# ----------------------------------------------------------------------------

def _mm_scale_res_kernel(x_ref, w_ref, bias_ref, ls_ref, res_ref, o_ref):
    acc = jnp.dot(x_ref[...], w_ref[...], preferred_element_type=jnp.float32)
    o_ref[...] = res_ref[...] + (acc + bias_ref[...]) * ls_ref[...]


def matmul_scale_residual(x, w, bias, ls, res, tm=256, tn=256):
    """res + (x @ w + bias) * ls"""
    M, K = x.shape
    _, N = w.shape
    TM = min(tm, _round_up(M, 8))
    TN = min(tn, _round_up(N, 128))
    Mp, Np = _round_up(M, TM), _round_up(N, TN)
    x_p = jnp.pad(x.astype(jnp.bfloat16), ((0, Mp - M), (0, 0)))
    w_p = jnp.pad(w.astype(jnp.bfloat16), ((0, 0), (0, Np - N)))
    b_p = jnp.pad(bias.astype(jnp.float32), (0, Np - N)).reshape(1, Np)
    ls_p = jnp.pad(ls.astype(jnp.float32), (0, Np - N)).reshape(1, Np)
    r_p = jnp.pad(res.astype(jnp.float32), ((0, Mp - M), (0, Np - N)))
    out = pl.pallas_call(
        _mm_scale_res_kernel,
        out_shape=jax.ShapeDtypeStruct((Mp, Np), jnp.float32),
        grid=(Mp // TM, Np // TN),
        in_specs=[
            pl.BlockSpec((TM, K), lambda i, j: (i, 0)),
            pl.BlockSpec((K, TN), lambda i, j: (0, j)),
            pl.BlockSpec((1, TN), lambda i, j: (0, j)),
            pl.BlockSpec((1, TN), lambda i, j: (0, j)),
            pl.BlockSpec((TM, TN), lambda i, j: (i, j)),
        ],
        out_specs=pl.BlockSpec((TM, TN), lambda i, j: (i, j)),
        compiler_params=pltpu.CompilerParams(
            dimension_semantics=("parallel", "parallel"),
            vmem_limit_bytes=VMEM_LIMIT),
    )(x_p, w_p, b_p, ls_p, r_p)
    return out[:M, :N]


# ----------------------------------------------------------------------------
# Fused attention (per-head: scale, QK^T, softmax, PV in one kernel)
# ----------------------------------------------------------------------------

def _attn_kernel(q_ref, k_ref, v_ref, o_ref, *, scale):
    q = q_ref[...]
    k = k_ref[...]
    v = v_ref[...]
    s = jnp.einsum("btd,bsd->bts", q, k,
                   preferred_element_type=jnp.float32) * scale
    m = jnp.max(s, axis=-1, keepdims=True)
    e = jnp.exp(s - m)
    p = e * pl.reciprocal(jnp.sum(e, axis=-1, keepdims=True), approx=True)
    o_ref[...] = jnp.einsum("bts,bsd->btd", p.astype(v.dtype), v,
                            preferred_element_type=jnp.float32)


def fused_attention(q, k, v, scale):
    # TODO(synk): whole-T block per head; at real T (~1370) this should become
    # a Tq/Tk-tiled online-softmax (flash) kernel.
    BH, T, dh = q.shape
    return pl.pallas_call(
        functools.partial(_attn_kernel, scale=scale),
        out_shape=jax.ShapeDtypeStruct((BH, T, dh), jnp.float32),
        grid=(BH,),
        in_specs=[pl.BlockSpec((1, T, dh), lambda g: (g, 0, 0))] * 3,
        out_specs=pl.BlockSpec((1, T, dh), lambda g: (g, 0, 0)),
        compiler_params=pltpu.CompilerParams(
            dimension_semantics=("parallel",), vmem_limit_bytes=VMEM_LIMIT),
    )(q.astype(jnp.bfloat16), k.astype(jnp.bfloat16), v.astype(jnp.bfloat16))


# ----------------------------------------------------------------------------
# Row-tiled elementwise kernels (LayerNorm for taps, add)
# ----------------------------------------------------------------------------

def _ln_kernel(x_ref, g_ref, b_ref, o_ref, *, eps):
    x = x_ref[...]
    mu = jnp.mean(x, axis=-1, keepdims=True)
    xc = x - mu
    var = jnp.mean(xc * xc, axis=-1, keepdims=True)
    o_ref[...] = xc * jax.lax.rsqrt(var + eps) * g_ref[...] + b_ref[...]


def layernorm(x, gamma, beta, eps=1e-6, tm=512):
    shp = x.shape
    C = shp[-1]
    x2 = x.reshape(-1, C).astype(jnp.float32)
    M = x2.shape[0]
    TM = min(tm, _round_up(M, 8))
    Mp = _round_up(M, TM)
    x_p = jnp.pad(x2, ((0, Mp - M), (0, 0)))
    out = pl.pallas_call(
        functools.partial(_ln_kernel, eps=eps),
        out_shape=jax.ShapeDtypeStruct((Mp, C), jnp.float32),
        grid=(Mp // TM,),
        in_specs=[pl.BlockSpec((TM, C), lambda i: (i, 0)),
                  pl.BlockSpec((1, C), lambda i: (0, 0)),
                  pl.BlockSpec((1, C), lambda i: (0, 0))],
        out_specs=pl.BlockSpec((TM, C), lambda i: (i, 0)),
        compiler_params=pltpu.CompilerParams(
            dimension_semantics=("parallel",), vmem_limit_bytes=VMEM_LIMIT),
    )(x_p, gamma.reshape(1, C).astype(jnp.float32),
      beta.reshape(1, C).astype(jnp.float32))
    return out[:M].reshape(shp)


def _add_kernel(x_ref, y_ref, o_ref):
    o_ref[...] = x_ref[...] + y_ref[...]


def ew_add(x, y, tm=512):
    shp = x.shape
    C = shp[-1]
    x2 = x.reshape(-1, C).astype(jnp.float32)
    y2 = y.reshape(-1, C).astype(jnp.float32)
    M = x2.shape[0]
    TM = min(tm, _round_up(M, 8))
    Mp = _round_up(M, TM)
    x_p = jnp.pad(x2, ((0, Mp - M), (0, 0)))
    y_p = jnp.pad(y2, ((0, Mp - M), (0, 0)))
    out = pl.pallas_call(
        _add_kernel,
        out_shape=jax.ShapeDtypeStruct((Mp, C), jnp.float32),
        grid=(Mp // TM,),
        in_specs=[pl.BlockSpec((TM, C), lambda i: (i, 0))] * 2,
        out_specs=pl.BlockSpec((TM, C), lambda i: (i, 0)),
        compiler_params=pltpu.CompilerParams(
            dimension_semantics=("parallel",), vmem_limit_bytes=VMEM_LIMIT),
    )(x_p, y_p)
    return out[:M].reshape(shp)


# ----------------------------------------------------------------------------
# NHWC convolutions / deconv / bilinear resize
# ----------------------------------------------------------------------------

def conv1x1_nhwc(x, w, b=None, act="none"):
    # x: (N,H,W,C); w: (Cout, Cin)
    N, H, W, C = x.shape
    y = pallas_matmul(x.reshape(N * H * W, C), jnp.transpose(w), b, act)
    return y.reshape(N, H, W, -1)


def _conv3x3_kernel(*refs, H, Wp, act, in_act, has_res):
    # x_ref: (1, (H+3)*Wp, C) padded + spatially-flattened NHWC input.
    # w_ref: (9, C, Cout); b_ref: (1, Cout); optional res_ref: (1, H*Wp, Cout)
    # o_ref: (1, H*Wp, Cout)  (the 2 extra columns per row are discarded later)
    if has_res:
        x_ref, w_ref, b_ref, res_ref, o_ref = refs
    else:
        x_ref, w_ref, b_ref, o_ref = refs
        res_ref = None
    L = H * Wp
    acc = None
    for t in range(9):
        ky, kx = divmod(t, 3)
        seg = x_ref[0, pl.ds(ky * Wp + kx, L), :]
        if in_act == "relu":
            seg = jnp.maximum(seg, 0.0)
        d = jnp.dot(seg.astype(jnp.bfloat16), w_ref[t],
                    preferred_element_type=jnp.float32)
        acc = d if acc is None else acc + d
    acc = _apply_act(acc + b_ref[...], act)
    if has_res:
        acc = acc + res_ref[0]
    o_ref[0] = acc


def conv3x3_nhwc(x, w, b=None, act="none", in_act="none", residual=None):
    """Conv2d(k=3, stride=1, padding=1) in NHWC.

    9-tap in-kernel accumulation: the padded activation stays in VMEM and each
    tap is a shifted 2-D dot -- no 9x im2col expansion in HBM.  Optional fused
    ReLU prologue (`in_act`) and fused residual add (ResidualConvUnit).
    TODO(synk): whole spatial extent per batch item; very large resolutions
    would need a spatially-tiled grid with overlapping halo DMAs.
    """
    N, H, W, C = x.shape
    Cout = w.shape[0]
    Wp = W + 2
    xp = jnp.pad(x, ((0, 0), (1, 2), (1, 1), (0, 0)))       # (N, H+3, W+2, C)
    xf = xp.reshape(N, (H + 3) * Wp, C).astype(jnp.float32)
    wk = jnp.transpose(w, (2, 3, 1, 0)).reshape(9, C, Cout).astype(jnp.bfloat16)
    bias = (jnp.zeros((Cout,), jnp.float32) if b is None else b)
    bias = bias.astype(jnp.float32).reshape(1, Cout)
    args = [xf, wk, bias]
    in_specs = [
        pl.BlockSpec((1, (H + 3) * Wp, C), lambda n: (n, 0, 0)),
        pl.BlockSpec((9, C, Cout), lambda n: (0, 0, 0)),
        pl.BlockSpec((1, Cout), lambda n: (0, 0)),
    ]
    has_res = residual is not None
    if has_res:
        rp = jnp.pad(residual.astype(jnp.float32),
                     ((0, 0), (0, 0), (0, 2), (0, 0))).reshape(N, H * Wp, Cout)
        args.append(rp)
        in_specs.append(pl.BlockSpec((1, H * Wp, Cout), lambda n: (n, 0, 0)))
    out = pl.pallas_call(
        functools.partial(_conv3x3_kernel, H=H, Wp=Wp, act=act, in_act=in_act,
                          has_res=has_res),
        out_shape=jax.ShapeDtypeStruct((N, H * Wp, Cout), jnp.float32),
        grid=(N,),
        in_specs=in_specs,
        out_specs=pl.BlockSpec((1, H * Wp, Cout), lambda n: (n, 0, 0)),
        compiler_params=pltpu.CompilerParams(
            dimension_semantics=("parallel",), vmem_limit_bytes=VMEM_LIMIT),
    )(*args)
    return out.reshape(N, H, Wp, Cout)[:, :, :W, :]


def conv3x3_s2_nhwc(x, w, b=None, act="none"):
    # Conv2d(k=3, stride=2, padding=1) via channel-last im2col (used once, on a
    # tiny feature map) feeding the tiled matmul.
    N, H, W, C = x.shape
    Cout = w.shape[0]
    Ho = (H + 2 - 3) // 2 + 1
    Wo = (W + 2 - 3) // 2 + 1
    xp = jnp.pad(x, ((0, 0), (1, 1), (1, 1), (0, 0)))
    cols = []
    for ky in range(3):
        for kx in range(3):
            cols.append(xp[:, ky:ky + 2 * (Ho - 1) + 1:2,
                           kx:kx + 2 * (Wo - 1) + 1:2, :])
    p = jnp.concatenate(cols, axis=-1)                       # (N,Ho,Wo,9C)
    wf = jnp.transpose(w, (2, 3, 1, 0)).reshape(9 * C, Cout)
    y = pallas_matmul(p.reshape(N * Ho * Wo, 9 * C), wf, b, act)
    return y.reshape(N, Ho, Wo, Cout)


def deconv_k_eq_s_nhwc(x, w, b, k):
    # ConvTranspose2d with kernel_size == stride == k, padding 0, NHWC.
    # x: (N,H,W,Cin); w: (Cin, Cout, k, k); b: (Cout,)
    N, H, W, C = x.shape
    Cout = w.shape[1]
    bias = jnp.repeat(b, k * k)
    y = pallas_matmul(x.reshape(N * H * W, C), w.reshape(C, Cout * k * k), bias)
    y = y.reshape(N, H, W, Cout, k, k)
    return y.transpose(0, 1, 4, 2, 5, 3).reshape(N, H * k, W * k, Cout)


def _interp_matrix(src, dst):
    # Bilinear interpolation weights, align_corners=True (PyTorch semantics).
    if dst == 1:
        m = np.zeros((1, src), np.float32)
        m[0, 0] = 1.0
        return m
    coords = np.arange(dst, dtype=np.float64) * (src - 1) / (dst - 1)
    lo = np.clip(np.floor(coords).astype(np.int64), 0, src - 1)
    hi = np.minimum(lo + 1, src - 1)
    frac = (coords - lo).astype(np.float32)
    m = np.zeros((dst, src), np.float32)
    np.add.at(m, (np.arange(dst), lo), 1.0 - frac)
    np.add.at(m, (np.arange(dst), hi), frac)
    return m


def _bmm_shared_kernel(a_ref, x_ref, o_ref):
    o_ref[0] = jnp.dot(a_ref[...], x_ref[0], preferred_element_type=jnp.float32)


def shared_lhs_bmm(a, x):
    """out[g] = a @ x[g].  a: (M,K) shared, x: (G,K,N) -> (G,M,N)."""
    G, K, N = x.shape
    M = a.shape[0]
    return pl.pallas_call(
        _bmm_shared_kernel,
        out_shape=jax.ShapeDtypeStruct((G, M, N), jnp.float32),
        grid=(G,),
        in_specs=[pl.BlockSpec((M, K), lambda g: (0, 0)),
                  pl.BlockSpec((1, K, N), lambda g: (g, 0, 0))],
        out_specs=pl.BlockSpec((1, M, N), lambda g: (g, 0, 0)),
        compiler_params=pltpu.CompilerParams(
            dimension_semantics=("parallel",), vmem_limit_bytes=VMEM_LIMIT),
    )(a.astype(jnp.float32), x.astype(jnp.float32))


def bilinear_resize_nhwc(x, Ho, Wo):
    # F.interpolate(mode='bilinear', align_corners=True) in NHWC: two
    # shared-LHS batched matmuls, no intermediate transpose, channels on lanes.
    N, H, W, C = x.shape
    if (H, W) == (Ho, Wo):
        return x
    if H == 1 and W == 1:                                    # pure replication
        return jnp.broadcast_to(x, (N, Ho, Wo, C)).astype(jnp.float32)
    Ah = jnp.asarray(_interp_matrix(H, Ho))                  # (Ho, H)
    Aw = jnp.asarray(_interp_matrix(W, Wo))                  # (Wo, W)
    t = shared_lhs_bmm(Ah, x.reshape(N, H, W * C))           # (N, Ho, W*C)
    t = shared_lhs_bmm(Aw, t.reshape(N * Ho, W, C))          # (N*Ho, Wo, C)
    return t.reshape(N, Ho, Wo, C)


# ----------------------------------------------------------------------------
# DINOv2 backbone (scaled down)
# ----------------------------------------------------------------------------

def vit_block(x2d, p, B, T, num_heads):
    D = x2d.shape[-1]
    dh = D // num_heads
    # LN fused into the qkv matmul.
    qkv = ln_matmul(x2d, p["norm1_w"], p["norm1_b"], p["qkv_w"].T, p["qkv_b"])
    qkv = qkv.reshape(B, T, 3, num_heads, dh).transpose(2, 0, 3, 1, 4)
    q = qkv[0].reshape(B * num_heads, T, dh)
    k = qkv[1].reshape(B * num_heads, T, dh)
    v = qkv[2].reshape(B * num_heads, T, dh)
    attn = fused_attention(q, k, v, scale=dh ** -0.5)
    attn = attn.reshape(B, num_heads, T, dh).transpose(0, 2, 1, 3)
    attn = attn.reshape(B * T, D)
    # out-proj with fused layer-scale + residual.
    x2d = matmul_scale_residual(attn, p["proj_w"].T, p["proj_b"], p["ls1"], x2d)
    # LN fused into fc1 (GELU epilogue); fc2 with fused layer-scale + residual.
    h = ln_matmul(x2d, p["norm2_w"], p["norm2_b"], p["fc1_w"].T, p["fc1_b"],
                  act="gelu")
    x2d = matmul_scale_residual(h, p["fc2_w"].T, p["fc2_b"], p["ls2"], x2d)
    return x2d


def dinov2_get_intermediate_layers(x, params, cfg):
    # Returns [(patch_tokens, cls_token), ...] with the final LayerNorm applied
    # (norm=True, as in DINOv2.get_intermediate_layers).
    B, C, H, W = x.shape
    P = 14
    ph, pw = H // P, W // P
    D = cfg["embed_dim"]
    xp = x.reshape(B, C, ph, P, pw, P).transpose(0, 2, 4, 1, 3, 5)
    xp = xp.reshape(B * ph * pw, C * P * P)
    tok = pallas_matmul(xp, params["patch_w"].reshape(D, -1).T,
                        params["patch_b"])
    tok = tok.reshape(B, ph * pw, D)
    cls = jnp.broadcast_to(params["cls_token"], (B, 1, D))
    t = jnp.concatenate([cls, tok], axis=1)
    # TODO(synk): real DINOv2 bicubically interpolates pos_embed to the input
    # grid; here pos_embed is constructed for exactly this token count.
    t = t + params["pos_embed"]
    T = t.shape[1]
    x2d = t.reshape(B * T, D)
    take = set(INTERMEDIATE_IDX[cfg["encoder"]])
    taps = []
    for i, blk in enumerate(params["blocks"]):
        x2d = vit_block(x2d, blk, B, T, cfg["num_heads"])
        if i in take:
            taps.append(x2d)
    feats = []
    for o in taps:
        o = layernorm(o, params["norm_w"], params["norm_b"]).reshape(B, T, D)
        feats.append((o[:, 1:], o[:, 0]))
    return feats


# ----------------------------------------------------------------------------
# DPT head (NHWC end-to-end)
# ----------------------------------------------------------------------------

def residual_conv_unit(x, p):
    # relu -> conv1 -> relu -> conv2 -> (+x); the leading relu is fused as the
    # conv1 prologue, the trailing relu as its epilogue, and the residual add
    # as conv2's epilogue.
    h = conv3x3_nhwc(x, p["conv1_w"], p["conv1_b"], act="relu", in_act="relu")
    return conv3x3_nhwc(h, p["conv2_w"], p["conv2_b"], residual=x)


def feature_fusion_block(p, x0, x1=None, size=None):
    out = x0
    if x1 is not None:
        out = ew_add(out, residual_conv_unit(x1, p["rcu1"]))
    out = residual_conv_unit(out, p["rcu2"])
    if size is None:
        Ho, Wo = out.shape[1] * 2, out.shape[2] * 2          # scale_factor=2
    else:
        Ho, Wo = size
    out = bilinear_resize_nhwc(out, Ho, Wo)
    return conv1x1_nhwc(out, p["out_conv_w"], p["out_conv_b"])


def dpt_head(feats, params, ph, pw):
    outs = []
    for i, (x_tok, _cls) in enumerate(feats):                # use_clstoken=False
        B, Np, D = x_tok.shape
        x = x_tok.reshape(B, ph, pw, D)                      # NHWC, no transpose
        x = conv1x1_nhwc(x, params["proj_w"][i], params["proj_b"][i])
        if i == 0:
            x = deconv_k_eq_s_nhwc(x, params["resize0_w"], params["resize0_b"], 4)
        elif i == 1:
            x = deconv_k_eq_s_nhwc(x, params["resize1_w"], params["resize1_b"], 2)
        elif i == 3:
            x = conv3x3_s2_nhwc(x, params["resize3_w"], params["resize3_b"])
        outs.append(x)
    l1, l2, l3, l4 = outs
    l1rn = conv3x3_nhwc(l1, params["layer1_rn_w"])           # bias=False
    l2rn = conv3x3_nhwc(l2, params["layer2_rn_w"])
    l3rn = conv3x3_nhwc(l3, params["layer3_rn_w"])
    l4rn = conv3x3_nhwc(l4, params["layer4_rn_w"])
    path4 = feature_fusion_block(params["ref4"], l4rn, None, size=l3rn.shape[1:3])
    path3 = feature_fusion_block(params["ref3"], path4, l3rn, size=l2rn.shape[1:3])
    path2 = feature_fusion_block(params["ref2"], path3, l2rn, size=l1rn.shape[1:3])
    path1 = feature_fusion_block(params["ref1"], path2, l1rn, size=None)
    o = conv3x3_nhwc(path1, params["oc1_w"], params["oc1_b"])
    o = bilinear_resize_nhwc(o, ph * 14, pw * 14)
    o = conv3x3_nhwc(o, params["oc2_0_w"], params["oc2_0_b"], act="relu")
    o = conv1x1_nhwc(o, params["oc2_2_w"], params["oc2_2_b"], act="relu")
    return o                                                 # (B, 14ph, 14pw, 1)


def depth_anything_v2_forward(x, params, cfg):
    B, _, H, W = x.shape
    ph, pw = H // 14, W // 14
    feats = dinov2_get_intermediate_layers(x, params, cfg)
    depth = dpt_head(feats, params, ph, pw)
    # The final F.relu(depth) of the PyTorch forward is a no-op here: the last
    # conv already applies ReLU in its epilogue (relu∘relu == relu).
    return depth[..., 0]                                     # squeeze channel


# ----------------------------------------------------------------------------
# Deterministic synthetic parameters
# ----------------------------------------------------------------------------

def init_params(key, cfg, num_patches):
    D = cfg["embed_dim"]
    Dh = D * cfg["mlp_ratio"]
    feat = cfg["features"]
    oc = cfg["out_channels"]
    keys = iter(jax.random.split(key, 1024))

    def w(shape, scale=0.05):
        return jax.random.normal(next(keys), shape, jnp.float32) * scale

    def zeros(shape):
        return jnp.zeros(shape, jnp.float32)

    p = {
        "patch_w": w((D, 3, 14, 14)), "patch_b": zeros((D,)),
        "cls_token": w((1, 1, D)), "pos_embed": w((1, 1 + num_patches, D)),
        "norm_w": jnp.ones((D,), jnp.float32), "norm_b": zeros((D,)),
    }
    blocks = []
    for _ in range(cfg["depth"]):
        blocks.append(dict(
            norm1_w=jnp.ones((D,), jnp.float32), norm1_b=zeros((D,)),
            qkv_w=w((3 * D, D)), qkv_b=zeros((3 * D,)),
            proj_w=w((D, D)), proj_b=zeros((D,)),
            ls1=jnp.ones((D,), jnp.float32),
            norm2_w=jnp.ones((D,), jnp.float32), norm2_b=zeros((D,)),
            fc1_w=w((Dh, D)), fc1_b=zeros((Dh,)),
            fc2_w=w((D, Dh)), fc2_b=zeros((D,)),
            ls2=jnp.ones((D,), jnp.float32),
        ))
    p["blocks"] = blocks

    p["proj_w"] = [w((oc[i], D)) for i in range(4)]
    p["proj_b"] = [zeros((oc[i],)) for i in range(4)]
    p["resize0_w"] = w((oc[0], oc[0], 4, 4)); p["resize0_b"] = zeros((oc[0],))
    p["resize1_w"] = w((oc[1], oc[1], 2, 2)); p["resize1_b"] = zeros((oc[1],))
    p["resize3_w"] = w((oc[3], oc[3], 3, 3)); p["resize3_b"] = zeros((oc[3],))
    for i in range(4):
        p[f"layer{i+1}_rn_w"] = w((feat, oc[i], 3, 3))       # bias=False

    def rcu():
        return dict(conv1_w=w((feat, feat, 3, 3)), conv1_b=zeros((feat,)),
                    conv2_w=w((feat, feat, 3, 3)), conv2_b=zeros((feat,)))

    for r in (1, 2, 3, 4):
        p[f"ref{r}"] = dict(rcu1=rcu(), rcu2=rcu(),
                            out_conv_w=w((feat, feat)), out_conv_b=zeros((feat,)))
    p["oc1_w"] = w((feat // 2, feat, 3, 3)); p["oc1_b"] = zeros((feat // 2,))
    p["oc2_0_w"] = w((32, feat // 2, 3, 3)); p["oc2_0_b"] = zeros((32,))
    p["oc2_2_w"] = w((1, 32)); p["oc2_2_b"] = zeros((1,))
    return p


if __name__ == "__main__":
    cfg = dict(encoder="vits", embed_dim=32, depth=12, num_heads=2, mlp_ratio=4,
               features=32, out_channels=(16, 32, 64, 64))
    B, H, W = 2, 28, 28                                      # H, W multiples of 14
    ph, pw = H // 14, W // 14
    key = jax.random.PRNGKey(0)
    kp, kx = jax.random.split(key)
    params = init_params(kp, cfg, num_patches=ph * pw)
    x = jax.random.normal(kx, (B, 3, H, W), jnp.float32)
    depth = depth_anything_v2_forward(x, params, cfg)
    depth = jax.block_until_ready(depth)
    assert depth.shape == (B, H, W), depth.shape
    assert bool(jnp.all(jnp.isfinite(depth)))
    assert bool(jnp.all(depth >= 0.0))
    print("KERNEL_OK")
</pallas_src>

<mosaic_0001>
module attributes {stable_mosaic.version = 11 : i64} {
  func.func @_mm_kernel(%arg0: i32, %arg1: i32, %arg2: i32, %arg3: memref<8x640xbf16, #tpu.memory_space<vmem>>, %arg4: memref<640x128xbf16, #tpu.memory_space<vmem>>, %arg5: memref<1x128xf32, #tpu.memory_space<vmem>>, %arg6: memref<8x128xf32, #tpu.memory_space<vmem>>, %arg7: memref<8x128xf32, #tpu.memory_space<vmem>>) attributes {dimension_semantics = [#tpu.dimension_semantics<parallel>, #tpu.dimension_semantics<parallel>, #tpu.dimension_semantics<arbitrary>], iteration_bounds = array<i64: 1, 1, 1>, scalar_prefetch = 0 : i64, scratch_operands = 1 : i64, tpu.core_type = #tpu.core_type<tc>, window_params = [{transform_indices = @transform_0, window_bounds = array<i64: 8, 640>}, {transform_indices = @transform_1, window_bounds = array<i64: 640, 128>}, {transform_indices = @transform_2, window_bounds = array<i64: 1, 128>}, {transform_indices = @transform_3, window_bounds = array<i64: 8, 128>}]} {
    %c0_i32 = arith.constant 0 : i32
    %0 = arith.cmpi eq, %arg2, %c0_i32 : i32
    %1 = arith.extui %0 : i1 to i32
    %c0_i32_0 = arith.constant 0 : i32
    %2 = arith.cmpi ne, %1, %c0_i32_0 : i32
    scf.if %2 {
      %cst_10 = arith.constant 0.000000e+00 : f32
      %12 = vector.broadcast %cst_10 : f32 to vector<8x128xf32>
      %c0_11 = arith.constant 0 : index
      %c0_12 = arith.constant 0 : index
      %13 = vector.load %arg7[%c0_11, %c0_12] : memref<8x128xf32, #tpu.memory_space<vmem>>, vector<8x128xf32>
      tpu.vector_store %arg7[%c0_11, %c0_12], %12 {strides = array<i32>} : memref<8x128xf32, #tpu.memory_space<vmem>>, vector<8x128xf32>,
    } else {
    }
    %c0 = arith.constant 0 : index
    %c0_1 = arith.constant 0 : index
    %3 = vector.load %arg7[%c0, %c0_1] : memref<8x128xf32, #tpu.memory_space<vmem>>, vector<8x128xf32>
    %c0_2 = arith.constant 0 : index
    %c0_3 = arith.constant 0 : index
    %4 = vector.load %arg3[%c0_2, %c0_3] : memref<8x640xbf16, #tpu.memory_space<vmem>>, vector<8x640xbf16>
    %c0_4 = arith.constant 0 : index
    %c0_5 = arith.constant 0 : index
    %5 = vector.load %arg4[%c0_4, %c0_5] : memref<640x128xbf16, #tpu.memory_space<vmem>>, vector<640x128xbf16>
    %cst = arith.constant dense<0.000000e+00> : vector<8x128xf32>
    %6 = tpu.matmul %4, %5, %cst {dimension_numbers = #tpu.dot_dimension_numbers<[1], [0], [0], [1], [0, 0, 1, 1], [], []>} : vector<8x640xbf16>, vector<640x128xbf16>, vector<8x128xf32> -> vector<8x128xf32>
    %7 = arith.addf %3, %6 : vector<8x128xf32>
    %c0_6 = arith.constant 0 : index
    %c0_7 = arith.constant 0 : index
    %8 = vector.load %arg7[%c0_6, %c0_7] : memref<8x128xf32, #tpu.memory_space<vmem>>, vector<8x128xf32>
    tpu.vector_store %arg7[%c0_6, %c0_7], %7 {strides = array<i32>} : memref<8x128xf32, #tpu.memory_space<vmem>>, vector<8x128xf32>,
    %c0_i32_8 = arith.constant 0 : i32
    %9 = arith.cmpi eq, %arg2, %c0_i32_8 : i32
    %10 = arith.extui %9 : i1 to i32
    %c0_i32_9 = arith.constant 0 : i32
    %11 = arith.cmpi ne, %10, %c0_i32_9 : i32
    scf.if %11 {
      %c0_10 = arith.constant 0 : index
      %c0_11 = arith.constant 0 : index
      %12 = vector.load %arg7[%c0_10, %c0_11] : memref<8x128xf32, #tpu.memory_space<vmem>>, vector<8x128xf32>
      %c0_12 = arith.constant 0 : index
      %c0_13 = arith.constant 0 : index
      %13 = vector.load %arg5[%c0_12, %c0_13] : memref<1x128xf32, #tpu.memory_space<vmem>>, vector<1x128xf32>
      %14 = vector.broadcast %13 : vector<1x128xf32> to vector<8x128xf32>
      %15 = arith.addf %12, %14 : vector<8x128xf32>
      %c0_14 = arith.constant 0 : index
      %c0_15 = arith.constant 0 : index
      %16 = vector.load %arg6[%c0_14, %c0_15] : memref<8x128xf32, #tpu.memory_space<vmem>>, vector<8x128xf32>
      tpu.vector_store %arg6[%c0_14, %c0_15], %15 {strides = array<i32>} : memref<8x128xf32, #tpu.memory_space<vmem>>, vector<8x128xf32>,
    } else {
    }
    return
  }
  func.func @transform_0(%arg0: i32, %arg1: i32, %arg2: i32) -> (i32, i32) {
    %c0_i32 = arith.constant 0 : i32
    return %arg0, %arg2 : i32, i32
  }
  func.func @transform_1(%arg0: i32, %arg1: i32, %arg2: i32) -> (i32, i32) {
    %c0_i32 = arith.constant 0 : i32
    return %arg2, %arg1 : i32, i32
  }
  func.func @transform_2(%arg0: i32, %arg1: i32, %arg2: i32) -> (i32, i32) {
    %c0_i32 = arith.constant 0 : i32
    %c0_i32_0 = arith.constant 0 : i32
    return %c0_i32, %arg1 : i32, i32
  }
  func.func @transform_3(%arg0: i32, %arg1: i32, %arg2: i32) -> (i32, i32) {
    %c0_i32 = arith.constant 0 : i32
    return %arg0, %arg1 : i32, i32
  }
}

</mosaic_0001>

<bundles_post_ra>
// kernel: tpu_custom_call.1
= control target key start
LH: loop header
LB: loop body
LE: loop exit
PB: predicated region body
PF: predicated region fallthrough
CT: control target
= control target key end

     0   :  { %8 = vsyncpa [#allocation4], 0  ;;  %s816_s0 = inlined_call_operand.hbm [shape: bf16[8,640], index: 0, kind: input, shape index: {}]   ;;  %s817_s1 = inlined_call_operand.hbm [shape: bf16[640,128], index: 1, kind: input, shape index: {}]   ;;  %s818_s2 = inlined_call_operand.vmem [shape: f32[1,128], index: 2, kind: input, shape index: {}]   ;;  %s819_s3 = inlined_call_operand.hbm [shape: f32[8,128], index: 3, kind: output, shape index: {}]  }
   0x1   :  { %9 = vsyncpa [#allocation7], 0 }
   0x2   :  { %10 = vsyncpa [#allocation5], 0  ;;  %s777_s12 = smov [#allocation3]   ;;  %s778_s14 = smov [#allocation6]  }
   0x3   :  { %s17_s13 = sshll.u32 %s777_s12, 4  ;;  %s26_s15 = sshll.u32 %s778_s14, 4  ;;  %s18_s13 = int_to_ptr.vmem [resolvable:$true] %s17_s13  ;;  %s27_s15 = int_to_ptr.vmem [resolvable:$true] %s26_s15 }
   0x4   :  { %s719_s16 = scalar_lea.vmem %s18_s13, 320  ;;  %p724_p1 = scmp.lt.s32.totalorder %s18_s13, %s18_s13 }
   0x5   :  { %p720_p0 = scmp.ne.s32.totalorder %s18_s13, %s719_s16  ;;  %p725_p2 = scmp.lt.s32.totalorder %s719_s16, %s719_s16 }
   0x7   :  { %p726_p3 = por %p725_p2, %p724_p1 }
   0x9   :  { %p727_p4 = pnand %p726_p3, %p720_p0 }
   0xb   :  { %730 = shalt.err (!%p727_p4)
}
   0xc   :  { %20 = dma.hbm_to_vmem [thread:$0]  %s816_s0, 320, %s18_s13, [#allocation4]  }
   0xd   :  { %s739_s19 = scalar_lea.vmem %s27_s15, 5120  ;;  %p744_p6 = scmp.lt.s32.totalorder %s27_s15, %s27_s15 }
   0xe   :  { %p740_p5 = scmp.ne.s32.totalorder %s27_s15, %s739_s19  ;;  %p745_p7 = scmp.lt.s32.totalorder %s739_s19, %s739_s19 }
  0x10   :  { %p746_p8 = por %p745_p7, %p744_p6 }
  0x12   :  { %p747_p9 = pnand %p746_p8, %p740_p5 }
  0x14   :  { %750 = shalt.err (!%p747_p9)
}
  0x15   :  { %s779_s20 = smov 64   ;;  %s780_s21 = smov 4  }
  0x16   :  { %32 = dma.hbm_to_vmem [thread:$0]  %s817_s1, 5120, %s27_s15, [#allocation7], %s779_s20, %s779_s20, %s780_s21  }
  0x17   :  { %771 = dma.done.wait [#allocation4], 320  }
  0x18   :  { %772 = vsyncadd [#allocation4], 4294966976 }
  0x19   :  { %773 = dma.done.wait [#allocation7], 5120  }
  0x1a   :  { %774 = vsyncadd [#allocation7], 4294962176  ;;  %v666_v0 = vld [vmem:[#allocation6 + $0x78] sm:$0xff]   ;;  %v670_v4 = vld [vmem:[#allocation6 + $0x70] sm:$0xff]   ;;  %v781_v39 = vmov 0.0   ;;  %vm782_vm0 = vmmov 0  }
  0x1b   :  { %v667_v1 = vld [vmem:[#allocation6 + $0xf8] sm:$0xff]   ;;  %586 = vmatprep.subr.bf16.mxu0 %v666_v0  ;;  %v671_v5 = vld [vmem:[#allocation6 + $0xf0] sm:$0xff]   ;;  %v674_v8 = vld [vmem:[#allocation6 + $0x68] sm:$0xff]   ;;  %s783_s24 = smov [#allocation8]  }
  0x1c   :  { %v668_v2 = vld [vmem:[#allocation6 + $0x38] sm:$0xff]   ;;  %608 = vmatprep.subr.bf16.mxu1 %v667_v1  ;;  %v672_v6 = vld [vmem:[#allocation6 + $0x30] sm:$0xff]   ;;  %v675_v9 = vld [vmem:[#allocation6 + $0xe8] sm:$0xff]   ;;  %s530_s25 = sshll.u32 %s783_s24, 4  ;;  %s531_s25 = int_to_ptr.vmem [resolvable:$true] %s530_s25 }
  0x1d   :  { %v669_v3 = vld [vmem:[#allocation6 + $0xb8] sm:$0xff]   ;;  %587 = vmatpush3.bf16.msra.mxu0 %v668_v2  ;;  %v673_v7 = vld [vmem:[#allocation6 + $0xb0] sm:$0xff]   ;;  %v676_v10 = vld [vmem:[#allocation6 + $0x28] sm:$0xff]   ;;  %s751_s26 = scalar_lea.vmem %s531_s25, 128  ;;  %p756_p11 = scmp.lt.s32.totalorder %s531_s25, %s531_s25 }
  0x1e   :  { %609 = vmatpush3.bf16.msra.mxu1 %v669_v3  ;;  %588 = vmatprep.subr.bf16.mxu0 %v670_v4  ;;  %v677_v11 = vld [vmem:[#allocation6 + $0xa8] sm:$0xff]   ;;  %v678_v12 = vld [vmem:[#allocation6 + $0x60] sm:$0xff]   ;;  %v682_v16 = vld [vmem:[#allocation6 + $0x58] sm:$0xff]   ;;  %p752_p10 = scmp.ne.s32.totalorder %s531_s25, %s751_s26  ;;  %p757_p12 = scmp.lt.s32.totalorder %s751_s26, %s751_s26 }
  0x1f   :  { %610 = vmatprep.subr.bf16.mxu1 %v671_v5  ;;  %v679_v13 = vld [vmem:[#allocation6 + $0xe0] sm:$0xff]   ;;  %v683_v17 = vld [vmem:[#allocation6 + $0xd8] sm:$0xff]   ;;  %v686_v20 = vld [vmem:[#allocation6 + $0x50] sm:$0xff]  }
  0x20   :  { %v680_v14 = vld [vmem:[#allocation6 + $0x20] sm:$0xff]   ;;  %v684_v18 = vld [vmem:[#allocation6 + $0x18] sm:$0xff]   ;;  %v687_v21 = vld [vmem:[#allocation6 + $0xd0] sm:$0xff]   ;;  %p758_p13 = por %p757_p12, %p756_p11 }
  0x21   :  { %589 = vmatpush3.bf16.msra.mxu0 %v672_v6  ;;  %v681_v15 = vld [vmem:[#allocation6 + $0xa0] sm:$0xff]   ;;  %v685_v19 = vld [vmem:[#allocation6 + $0x98] sm:$0xff]   ;;  %v688_v22 = vld [vmem:[#allocation6 + $0x10] sm:$0xff]  }
  0x22   :  { %611 = vmatpush3.bf16.msra.mxu1 %v673_v7  ;;  %590 = vmatprep.subr.bf16.mxu0 %v674_v8  ;;  %v689_v23 = vld [vmem:[#allocation6 + $0x90] sm:$0xff]   ;;  %v690_v24 = vld [vmem:[#allocation6 + $0x48] sm:$0xff]   ;;  %v694_v28 = vld [vmem:[#allocation6 + $0x40] sm:$0xff]   ;;  %p759_p0 = pnand %p758_p13, %p752_p10 }
  0x23   :  { %612 = vmatprep.subr.bf16.mxu1 %v675_v9  ;;  %v691_v25 = vld [vmem:[#allocation6 + $0xc8] sm:$0xff]   ;;  %v695_v29 = vld [vmem:[#allocation6 + $0xc0] sm:$0xff]   ;;  %v49_v33 = vld [vmem:[#allocation3 + $0x8] sm:$0xff] }
  0x24   :  { %v692_v26 = vld [vmem:[#allocation6 + $0x8] sm:$0xff]   ;;  %v696_v30 = vld [vmem:[#allocation6] sm:$0xff]   ;;  %v542_v36 = vcombine.low %v49_v33, %v49_v33  ;;  %v543_v37 = vcombine.high %v49_v33, %v49_v33  ;;  %v702_v38 = vld [vmem:[#allocation6 + $0x138] sm:$0xff]  }
  0x25   :  { %591 = vmatpush3.bf16.msra.mxu0 %v676_v10  ;;  %v693_v27 = vld [vmem:[#allocation6 + $0x88] sm:$0xff]   ;;  %v697_v31 = vld [vmem:[#allocation6 + $0x80] sm:$0xff]   ;;  %v703_v40 = vld [vmem:[#allocation6 + $0x130] sm:$0xff]  }
  0x26   :  { %613 = vmatpush3.bf16.msra.mxu1 %v677_v11  ;;  %592 = vmatprep.subr.bf16.mxu0 %v678_v12  ;;  %v48_v32 = vld [vmem:[#allocation3] sm:$0xff]  ;;  %v705_v42 = vld [vmem:[#allocation6 + $0x120] sm:$0xff]   ;;  %v706_v43 = vld [vmem:[#allocation6 + $0x118] sm:$0xff]  }
  0x27   :  { %614 = vmatprep.subr.bf16.mxu1 %v679_v13  ;;  %v540_v34 = vcombine.low %v48_v32, %v48_v32  ;;  %v541_v35 = vcombine.high %v48_v32, %v48_v32  ;;  %461 = vmatprep.mubr.bf16.mxu1 %v543_v37  ;;  %v704_v41 = vld [vmem:[#allocation6 + $0x128] sm:$0xff]   ;;  %v707_v44 = vld [vmem:[#allocation6 + $0x110] sm:$0xff]   ;;  %v709_v46 = vld [vmem:[#allocation6 + $0x100] sm:$0xff]  }
  0x28   :  { %v708_v45 = vld [vmem:[#allocation6 + $0x108] sm:$0xff]   ;;  %v710_v47 = vld [vmem:[#allocation3 + $0x10] ss:$0 sps:$4 sm:$0xff]  }
  0x29   :  { %593 = vmatpush3.bf16.msra.mxu0 %v680_v14  ;;  %421 = vmatprep.mubr.bf16.mxu0 %v541_v35  ;;  %v585_v60 = vld [vmem:[%s818_s2] ss:$0 sm:$0xff] }
  0x2a   :  { %615 = vmatpush3.bf16.msra.mxu1 %v681_v15  ;;  %594 = vmatprep.subr.bf16.mxu0 %v682_v16 }
  0x2b   :  { %616 = vmatprep.subr.bf16.mxu1 %v683_v17 }
  0x2d   :  { %595 = vmatpush3.bf16.msra.mxu0 %v684_v18 }
  0x2e   :  { %617 = vmatpush3.bf16.msra.mxu1 %v685_v19  ;;  %596 = vmatprep.subr.bf16.mxu0 %v686_v20 }
  0x2f   :  { %618 = vmatprep.subr.bf16.mxu1 %v687_v21 }
  0x31   :  { %597 = vmatpush3.bf16.msra.mxu0 %v688_v22 }
  0x32   :  { %619 = vmatpush3.bf16.msra.mxu1 %v689_v23  ;;  %598 = vmatprep.subr.bf16.mxu0 %v690_v24 }
  0x33   :  { %620 = vmatprep.subr.bf16.mxu1 %v691_v25 }
  0x35   :  { %599 = vmatpush3.bf16.msra.mxu0 %v692_v26 }
  0x36   :  { %621 = vmatpush3.bf16.msra.mxu1 %v693_v27  ;;  %600 = vmatprep.subr.bf16.mxu0 %v694_v28 }
  0x37   :  { %622 = vmatprep.subr.bf16.mxu1 %v695_v29 }
  0x39   :  { %601 = vmatpush3.bf16.msra.mxu0 %v696_v30 }
  0x3a   :  { %623 = vmatpush3.bf16.msra.mxu1 %v697_v31  ;;  %639 = vmatprep.subr.bf16.mxu0 %v781_v39 }
  0x3c   :  { %422 = vmatmul.mubr.bf16.vlgmr.msra.gmra.mxu0 %v540_v34 }
  0x3d   :  { %462 = vmatmul.mubr.bf16.vlgmr.msra.gmra.mxu1 %v542_v36  ;;  %640 = vmatpush3.bf16.msra.mxu0 %v702_v38 }
  0x3e   :  { %655 = vmatprep.mubr.msk.bf16.mxu0 %vm782_vm0, %v781_v39  ;;  %641 = vmatprep.subr.bf16.mxu0 %v781_v39 }
  0x41   :  { %642 = vmatpush3.bf16.msra.mxu0 %v703_v40 }
  0x42   :  { %643 = vmatprep.subr.bf16.mxu0 %v781_v39 }
  0x45   :  { %644 = vmatpush3.bf16.msra.mxu0 %v704_v41 }
  0x46   :  { %645 = vmatprep.subr.bf16.mxu0 %v781_v39 }
  0x49   :  { %646 = vmatpush3.bf16.msra.mxu0 %v705_v42 }
  0x4a   :  { %647 = vmatprep.subr.bf16.mxu0 %v781_v39 }
  0x4d   :  { %648 = vmatpush3.bf16.msra.mxu0 %v706_v43 }
  0x4e   :  { %649 = vmatprep.subr.bf16.mxu0 %v781_v39 }
  0x51   :  { %650 = vmatpush3.bf16.msra.mxu0 %v707_v44 }
  0x52   :  { %651 = vmatprep.subr.bf16.mxu0 %v781_v39 }
  0x55   :  { %652 = vmatpush3.bf16.msra.mxu0 %v708_v45 }
  0x56   :  { %653 = vmatprep.subr.bf16.mxu0 %v781_v39 }
  0x59   :  { %654 = vmatpush3.bf16.msra.mxu0 %v709_v46 }
  0x5c   :  { %656 = vmatmul.mubr.bf16.vlgmr.msra.gmra.mxu0 %v710_v47 }
  0xfc   :  { %v602_v48 = vpop.f32.mrf.mxu0 }
  0xfd   :  { %v624_v49 = vpop.f32.mrf.mxu1 }
  0xfe   :  { %v603_v50 = vpop.f32.mrf.mxu0 }
  0xff   :  { %v625_v51 = vpop.f32.mrf.mxu1  ;;  %v604_v56 = vadd.f32 %v603_v50, %v602_v48 }
 0x100   :  { %v605_v52 = vpop.f32.mrf.mxu0  ;;  %v626_v57 = vadd.f32 %v625_v51, %v624_v49 }
 0x101   :  { %v627_v53 = vpop.f32.mrf.mxu1 }
 0x102   :  { %v606_v54 = vpop.f32.mrf.mxu0  ;;  %v464_v58 = vadd.f32 %v626_v57, %v604_v56 }
 0x103   :  { %v628_v55 = vpop.f32.mrf.mxu1 }
 0x11c   :  { %v503_v59 = vpop.f32.mrf.mxu0 }
 0x11d   :  { %v504_v61 = vadd.f32 %v503_v59, %v464_v58 }
 0x11e   :  { %v657_v62 = vpop.f32.mrf.mxu0 }
 0x11f   :  { %v522_v63 = vadd.f32 %v585_v60, %v504_v61 }
 0x120   :  { %v506_v0 = vpop.f32.mrf.mxu0 }
 0x121   :  { %523 = vst [vmem:[#allocation8] sm:$0xff] %v522_v63 }
 0x122   :  { %v658_v1 = vpop.f32.mrf.mxu0 }
 0x123   :  { %762 = shalt.err (!%p759_p0)
}
 0x124   :  { %533 = dma.vmem_to_hbm [thread:$0]  %s531_s25, 128, %s819_s3, [#allocation5]  }
 0x125   :  { %775 = dma.done.wait [#allocation5], 128  }
 0x126   :  { %776 = vsyncadd [#allocation5], 4294967168 }
 0x127   :  { %537 = vsyncpa [#allocation4], 1 }
 0x128   :  { %538 = vsyncpa [#allocation7], 1 }
 0x129   :  { %539 = vsyncpa [#allocation5], 1 }

</bundles_post_ra>
